<compile_context>
chip_gen: v6e
topology: v6e:2x2x1
jax: 0.10.0
libtpu: 0.0.40
codegen_flags: <defaults>
</compile_context>

<pallas_src>
import functools

import jax
import jax.numpy as jnp
from jax.experimental import pallas as pl
from jax.experimental.pallas import tpu as pltpu


def _layernorm_kernel(x_ref, a_ref, b_ref, o_ref, *, eps):
    x = x_ref[...].astype(jnp.float32)                        # (tile_rows, F)
    n = x.shape[-1]
    # Two-pass moments (numerically safe): mean, then centered sum of squares.
    mean = jnp.sum(x, axis=-1, keepdims=True) * (1.0 / n)     # (tile_rows, 1)
    xc = x - mean                                              # (tile_rows, F)
    var = jnp.sum(xc * xc, axis=-1, keepdims=True) * (1.0 / (n - 1))  # unbiased
    std = jnp.sqrt(var)
    # PyTorch module adds eps to the STD (not the variance). Reciprocal only
    # on the (tile_rows, 1) column (EUP), then broadcast-multiply on the VPU.
    inv = pl.reciprocal(std + eps, approx=False)
    a = a_ref[...].astype(jnp.float32)                        # (1, F)
    b = b_ref[...].astype(jnp.float32)                        # (1, F)
    y = a * (xc * inv) + b
    o_ref[...] = y.astype(o_ref.dtype)


def _vmem_capacity_bytes():
    """Per-TensorCore VMEM capacity; conservative (v7x) fallback if unknown."""
    try:
        info = pltpu.get_tpu_info()
        cap = getattr(info, "vmem_capacity_bytes", None)
        if cap:
            return int(cap)
    except Exception:
        pass
    return 64 * 1024 * 1024


def _choose_tile_rows(rows, features, vmem_capacity):
    """Pick a row tile: sized off the f32 tile footprint (kernel upcasts x),
    generation-aware budget, and capped so the grid has ~8+ steps so the
    pipeline overlaps DMA/compute and both v7x cores get work."""
    if vmem_capacity <= 64 * 1024 * 1024:      # v7x: 64 MiB per TensorCore
        tile_f32_budget = 2 * 1024 * 1024
    else:                                       # v5e / v6e: 128 MiB
        tile_f32_budget = 4 * 1024 * 1024

    tr = tile_f32_budget // max(1, features * 4)
    tr = max(8, (tr // 8) * 8)                  # multiple of 8 sublanes

    rows_ceil8 = -(-rows // 8) * 8
    # Aim for >= ~8 grid steps (subject to the 8-row minimum tile).
    per_step = max(8, ((rows_ceil8 // 8) // 8) * 8)
    tr = min(tr, per_step, rows_ceil8)
    return max(8, tr)


def _layer_norm_xla(x, a_2, b_2, eps):
    mean = jnp.mean(x, axis=-1, keepdims=True)
    std = jnp.std(x, axis=-1, keepdims=True, ddof=1)
    return a_2 * (x - mean) / (std + eps) + b_2


def layer_norm(x, a_2, b_2, eps=1e-6, tile_rows=None):
    orig_shape = x.shape
    features = orig_shape[-1]

    # F == 1: unbiased divisor (n-1) == 0 -> match PyTorch's NaN semantics
    # via plain JAX instead of producing silent garbage in the kernel.
    if features < 2:
        return _layer_norm_xla(x, a_2, b_2, eps)

    x2d = x.reshape(-1, features)
    rows = x2d.shape[0]
    itemsize = jnp.dtype(x.dtype).itemsize

    vmem_capacity = _vmem_capacity_bytes()
    if tile_rows is None:
        tile_rows = _choose_tile_rows(rows, features, vmem_capacity)

    a2 = a_2.reshape(1, features)
    b2 = b_2.reshape(1, features)

    # No host-side padding: Pallas clips the partial last block. Every op in
    # the kernel is strictly per-row, so garbage out-of-bounds rows only feed
    # discarded out-of-bounds writes.
    grid = (pl.cdiv(rows, tile_rows),)

    # VMEM sizing: double-buffered in + out tiles (input dtype) plus ~3
    # full-tile f32 temporaries (upcast x, centered x, y) and params. The cap
    # is generation-aware (≈48 MiB on v7x's 64 MiB/TC, up to ~96 MiB on
    # 128 MiB v5e/v6e); the 32 MiB floor still beats v5e's 16 MiB default.
    tile_in_bytes = tile_rows * features * itemsize
    tile_f32_bytes = tile_rows * features * 4
    vmem_needed = 4 * tile_in_bytes + 3 * tile_f32_bytes + 8 * features * 4
    vmem_cap = max(32 * 1024 * 1024, (vmem_capacity * 3) // 4)
    vmem_limit = int(min(max(int(vmem_needed * 1.5) + (2 << 20),
                             32 * 1024 * 1024),
                         vmem_cap))

    out = pl.pallas_call(
        functools.partial(_layernorm_kernel, eps=eps),
        out_shape=jax.ShapeDtypeStruct((rows, features), x.dtype),
        grid_spec=pltpu.PrefetchScalarGridSpec(
            num_scalar_prefetch=0,
            grid=grid,
            in_specs=[
                pl.BlockSpec((tile_rows, features), lambda i: (i, 0)),
                pl.BlockSpec((1, features), lambda i: (0, 0)),
                pl.BlockSpec((1, features), lambda i: (0, 0)),
            ],
            out_specs=pl.BlockSpec((tile_rows, features), lambda i: (i, 0)),
        ),
        compiler_params=pltpu.CompilerParams(
            # "parallel" lets v7x shard the row loop across its 2 TensorCores;
            # near-neutral on v5e/v6e.
            dimension_semantics=("parallel",),
            vmem_limit_bytes=vmem_limit,
        ),
    )(x2d, a2, b2)

    return out.reshape(orig_shape)


def _reference(x, a_2, b_2, eps):
    mean = jnp.mean(x, axis=-1, keepdims=True)
    std = jnp.std(x, axis=-1, keepdims=True, ddof=1)
    return a_2 * (x - mean) / (std + eps) + b_2


if __name__ == "__main__":
    key = jax.random.PRNGKey(0)
    k1, k2 = jax.random.split(key)

    # Case 1: lane-dense feature dim (F multiple of 128), small shape.
    batch, seq, features = 2, 8, 128
    x1 = jax.random.normal(k1, (batch, seq, features), dtype=jnp.float32)
    a1 = jnp.ones((features,), dtype=jnp.float32)
    b1 = jnp.zeros((features,), dtype=jnp.float32)
    y1 = layer_norm(x1, a1, b1, eps=1e-6)
    jax.block_until_ready(y1)
    y1_ref = _reference(x1, a1, b1, 1e-6)
    assert jnp.allclose(y1, y1_ref, atol=1e-4, rtol=1e-4), (
        float(jnp.max(jnp.abs(y1 - y1_ref)))
    )

    # Case 2: lane-sparse F (32) + partial last grid block (21 rows) + a
    # non-zero mean / non-unit scale to exercise the two-pass variance path.
    x2 = jax.random.normal(k2, (3, 7, 32), dtype=jnp.float32) * 3.0 + 50.0
    a2 = jnp.ones((32,), dtype=jnp.float32)
    b2 = jnp.zeros((32,), dtype=jnp.float32)
    y2 = layer_norm(x2, a2, b2, eps=1e-6)
    jax.block_until_ready(y2)
    y2_ref = _reference(x2, a2, b2, 1e-6)
    assert jnp.allclose(y2, y2_ref, atol=1e-4, rtol=1e-4), (
        float(jnp.max(jnp.abs(y2 - y2_ref)))
    )

    print("KERNEL_OK")
</pallas_src>

<mosaic_0001>
module attributes {stable_mosaic.version = 11 : i64} {
  func.func @_layernorm_kernel(%arg0: i32, %arg1: memref<8x128xf32, #tpu.memory_space<vmem>>, %arg2: memref<1x128xf32, #tpu.memory_space<vmem>>, %arg3: memref<1x128xf32, #tpu.memory_space<vmem>>, %arg4: memref<8x128xf32, #tpu.memory_space<vmem>>) attributes {dimension_semantics = [#tpu.dimension_semantics<parallel>], iteration_bounds = array<i64: 2>, scalar_prefetch = 0 : i64, scratch_operands = 0 : i64, tpu.core_type = #tpu.core_type<tc>, window_params = [{transform_indices = @transform_0, window_bounds = array<i64: 8, 128>}, {pipeline_mode = #tpu.pipeline_mode<synchronous>, transform_indices = @transform_1, window_bounds = array<i64: 1, 128>}, {pipeline_mode = #tpu.pipeline_mode<synchronous>, transform_indices = @transform_2, window_bounds = array<i64: 1, 128>}, {transform_indices = @transform_3, window_bounds = array<i64: 8, 128>}]} {
    %c0 = arith.constant 0 : index
    %c0_0 = arith.constant 0 : index
    %0 = vector.load %arg1[%c0, %c0_0] : memref<8x128xf32, #tpu.memory_space<vmem>>, vector<8x128xf32>
    %cst = arith.constant dense<0.000000e+00> : vector<8xf32>
    %1 = vector.multi_reduction <add>, %0, %cst [1] : vector<8x128xf32> to vector<8xf32>
    %2 = vector.shape_cast %1 : vector<8xf32> to vector<8x1xf32>
    %cst_1 = arith.constant 7.812500e-03 : f32
    %3 = vector.broadcast %cst_1 : f32 to vector<8x1xf32>
    %4 = arith.mulf %2, %3 : vector<8x1xf32>
    %5 = vector.broadcast %4 : vector<8x1xf32> to vector<8x128xf32>
    %6 = arith.subf %0, %5 : vector<8x128xf32>
    %7 = arith.mulf %6, %6 : vector<8x128xf32>
    %cst_2 = arith.constant dense<0.000000e+00> : vector<8xf32>
    %8 = vector.multi_reduction <add>, %7, %cst_2 [1] : vector<8x128xf32> to vector<8xf32>
    %9 = vector.shape_cast %8 : vector<8xf32> to vector<8x1xf32>
    %cst_3 = arith.constant 0.00787401571 : f32
    %10 = vector.broadcast %cst_3 : f32 to vector<8x1xf32>
    %11 = arith.mulf %9, %10 : vector<8x1xf32>
    %12 = math.sqrt %11 : vector<8x1xf32>
    %cst_4 = arith.constant 9.99999997E-7 : f32
    %13 = vector.broadcast %cst_4 : f32 to vector<8x1xf32>
    %14 = arith.addf %12, %13 : vector<8x1xf32>
    %15 = tpu.reciprocal %14 : vector<8x1xf32> -> vector<8x1xf32>
    %c0_5 = arith.constant 0 : index
    %c0_6 = arith.constant 0 : index
    %16 = vector.load %arg2[%c0_5, %c0_6] : memref<1x128xf32, #tpu.memory_space<vmem>>, vector<1x128xf32>
    %c0_7 = arith.constant 0 : index
    %c0_8 = arith.constant 0 : index
    %17 = vector.load %arg3[%c0_7, %c0_8] : memref<1x128xf32, #tpu.memory_space<vmem>>, vector<1x128xf32>
    %18 = vector.broadcast %15 : vector<8x1xf32> to vector<8x128xf32>
    %19 = arith.mulf %6, %18 : vector<8x128xf32>
    %20 = vector.broadcast %16 : vector<1x128xf32> to vector<8x128xf32>
    %21 = arith.mulf %20, %19 : vector<8x128xf32>
    %22 = vector.broadcast %17 : vector<1x128xf32> to vector<8x128xf32>
    %23 = arith.addf %21, %22 : vector<8x128xf32>
    %c0_9 = arith.constant 0 : index
    %c0_10 = arith.constant 0 : index
    %24 = vector.load %arg4[%c0_9, %c0_10] : memref<8x128xf32, #tpu.memory_space<vmem>>, vector<8x128xf32>
    tpu.vector_store %arg4[%c0_9, %c0_10], %23 {strides = array<i32>} : memref<8x128xf32, #tpu.memory_space<vmem>>, vector<8x128xf32>,
    return
  }
  func.func @transform_0(%arg0: i32) -> (i32, i32) {
    %c0_i32 = arith.constant 0 : i32
    %c0_i32_0 = arith.constant 0 : i32
    return %arg0, %c0_i32 : i32, i32
  }
  func.func @transform_1(%arg0: i32) -> (i32, i32) {
    %c0_i32 = arith.constant 0 : i32
    %c0_i32_0 = arith.constant 0 : i32
    %c0_i32_1 = arith.constant 0 : i32
    return %c0_i32, %c0_i32_0 : i32, i32
  }
  func.func @transform_2(%arg0: i32) -> (i32, i32) {
    %c0_i32 = arith.constant 0 : i32
    %c0_i32_0 = arith.constant 0 : i32
    %c0_i32_1 = arith.constant 0 : i32
    return %c0_i32, %c0_i32_0 : i32, i32
  }
  func.func @transform_3(%arg0: i32) -> (i32, i32) {
    %c0_i32 = arith.constant 0 : i32
    %c0_i32_0 = arith.constant 0 : i32
    return %arg0, %c0_i32 : i32, i32
  }
}

</mosaic_0001>

<bundles_post_ra>
// kernel: tpu_custom_call.1
= control target key start
LH: loop header
LB: loop body
LE: loop exit
PB: predicated region body
PF: predicated region fallthrough
CT: control target
= control target key end

     0   :  { %8 = vsyncpa [#allocation3], 0  ;;  %s633_s0 = inlined_call_operand.hbm [shape: f32[16,128], index: 0, kind: input, shape index: {}]   ;;  %s634_s1 = inlined_call_operand.vmem [shape: f32[1,128], index: 1, kind: input, shape index: {}]   ;;  %s635_s2 = inlined_call_operand.vmem [shape: f32[1,128], index: 2, kind: input, shape index: {}]   ;;  %s636_s3 = inlined_call_operand.hbm [shape: f32[16,128], index: 3, kind: output, shape index: {}]  }
   0x1   :  { %10 = vsyncpa [#allocation3 + $0x1], 0 }
   0x2   :  { %11 = vsyncpa [#allocation4], 0 }
   0x3   :  { %13 = vsyncpa [#allocation4 + $0x1], 0  ;;  %s486_s12 = smov 0   ;;  %s488_s13 = smov 0  }
   0x4   :  { %s490_s14 = smov 0   ;;  %s492_s15 = smov 0  }
   0x5 LB: > { %s507_s16 = sadd.s32 4294967295, %s462_s15   ;;  %s306_s17 = sadd.s32 4294967294, %s462_s15   ;;  %s462_s15 = sphi %s492_s15, %s653_s15   ;;  %s458_s14 = sphi %s490_s14, %s652_s14   ;;  %s454_s13 = sphi %s488_s13, %s651_s13   ;;  %s450_s12 = sphi %s486_s12, %s650_s12  }
   0x6   : > { %s511_s18 = sadd.s32 1, %s462_s15   ;;  %s26_s19 = sadd.s32 1, %s458_s14 }
   0x7   : > { %s23_s20 = ssub.s32 %s462_s15, %s511_s18  ;;  %p33_p0 = scmp.ne.s32.totalorder %s458_s14, %s454_s13 }
   0x8   : > { %p24_p1 = scmp.eq.s32.totalorder %s23_s20, 0  ;;  %p34_p2 = scmp.eq.s32.totalorder %s462_s15, 0 }
   0x9   : > { %p39_p3 = scmp.ne.s32.totalorder %s454_s13, %s450_s12  ;;  %p40_p4 = scmp.eq.s32.totalorder %s507_s16, 0 }
   0xa   : > { %s523_s21 = scalar_select %p24_p1, %s458_s14, %s26_s19  }
   0xb   : > { %p525_p5 = por %p34_p2, %p33_p0  ;;  %p529_p6 = por %p40_p4, %p39_p3 }
   0xc   : > { %p105_p7 = scmp.eq.s32.totalorder %s507_s16, 1  ;;  %p111_p8 = scmp.eq.s32.totalorder %s306_s17, 1 }
   0xd   : > { %s640_s23 = scalar_select %p529_p6, 1, 0 }
   0xe   : > { %p332_p10 = scmp.lt.s32.totalorder %s462_s15, 2  ;;  %p536_p11 = por %p105_p7, %p33_p0 }
   0xf   : > { %p540_p12 = por %p111_p8, %p39_p3  ;;  %s137_s26 = sand.u32 1, %s458_s14  }
  0x10   : > { %s641_s24 = scalar_select %p536_p11, 1, 0 }
  0x11   : > { %s642_s25 = scalar_select %p540_p12, 1, 0 }
  0x12   : > { %s310_s27 = sshll.u32 %s462_s15, 7  ;;  %s309_s28 = sshll.u32 %s137_s26, 3 }
  0x13   : > { %s549_s4 = scalar_lea.hbm %s633_s0, %s310_s27  ;;  %s141_s5 = scalar_lea.vmem [#allocation2], %s309_s28 }
  0x14   : > { %s148_s6 = sshll.u32 %s141_s5, 4  ;;  %p553_p13 = pnand %p332_p10, %p525_p5  ;;  %s557_s6 = int_to_ptr.vmem [resolvable:$true] %s148_s6 }
  0x15   : > { %s138_s8 = scalar_lea.sflag [#allocation3], %s137_s26  ;;  %s370_s9 = scalar_lea.hbm %s549_s4, 128 }
  0x16   : > { %p371_p2 = scmp.ne.s32.totalorder %s549_s4, %s370_s9  ;;  %p372_p3 = pneg %p553_p13 }
  0x17   : > { %s375_s17 = scalar_lea.hbm %s633_s0, 256  ;;  %p376_p5 = scmp.lt.s32.totalorder %s549_s4, %s633_s0 }
  0x18   : > { %p373_p4 = pnand %p372_p3, %p371_p2  ;;  %p377_p8 = scmp.lt.s32.totalorder %s375_s17, %s370_s9 }
  0x1a   : > { %p374_p7 = pneg %p373_p4  ;;  %p378_p10 = por %p377_p8, %p376_p5 }
  0x1c   : > { %p379_p9 = pnand %p378_p10, %p374_p7 }
  0x1e   : > { %382 = shalt.err (!%p379_p9)
}
  0x1f   : > { %s383_s22 = scalar_lea.vmem %s557_s6, 128  ;;  %s464_s26 = smov [#allocation2]  }
  0x20   : > { %p384_p0 = scmp.ne.s32.totalorder %s557_s6, %s383_s22  ;;  %s388_s27 = sshll.u32 %s464_s26, 4  ;;  %s389_s27 = int_to_ptr.vmem [resolvable:$false] %s388_s27 }
  0x21   : > { %s390_s28 = scalar_lea.vmem %s389_s27, 256  ;;  %p391_p4 = scmp.lt.s32.totalorder %s557_s6, %s389_s27 }
  0x22   : > { %p386_p1 = pnand %p384_p0, %p372_p3  ;;  %p392_p12 = scmp.lt.s32.totalorder %s390_s28, %s383_s22 }
  0x24   : > { %p387_p2 = pneg %p386_p1  ;;  %p393_p11 = por %p392_p12, %p391_p4 }
  0x26   : > { %p394_p6 = pnand %p393_p11, %p387_p2 }
  0x28   : > { %397 = shalt.err (!%p394_p6)
}
  0x29   : > { %327 = dma.hbm_to_vmem [thread:$0]  (!%p553_p13), %s549_s4, 128, %s557_s6, %s138_s8  }
  0x2a   : > { %p644_p9 = scmp.lt.s32.totalorder %s462_s15, 3  ;;  %p645_p7 = scmp.ge.s32.totalorder %s462_s15, 1 }
  0x2c   : > { %p154_p0 = pnand %p645_p7, %p644_p9 }
  0x2d   : > { %s584_s29 = sand.u32 (!%p154_p0), 1, %s454_s13   ;;  %p646_p6 = scmp.ne.s32.totalorder (!%p154_p0), %s640_s23, 0 }
  0x2e   : > { %157 = sbr.rel (%p154_p0) target bundleno = 390 (0x186), region = 32  ;;  %s312_s30 = sshll.u32 (!%p154_p0), %s584_s29, 3 }
  0x2f   : > { %s160_s5 = scalar_lea.sflag (!%p154_p0), [#allocation3], %s584_s29  ;;  %s163_s9 = scalar_lea.vmem (!%p154_p0), [#allocation2], %s312_s30 }
  0x33   : > { %441 = dma.done.wait (%p646_p6), %s160_s5, 128  }
  0x34   : > { %443 = vsyncadd (%p646_p6), %s160_s5, 4294967168  ;;  %v186_v0 = vld [vmem:[%s163_s9] sm:$0xff]  ;;  %s317_s8 = sshll.u32 %s507_s16, 7  ;;  %s185_s10 = scalar_lea.vmem [#allocation5], %s312_s30 }
  0x35   : > { %187 = vadd.xlane.f32.xlu0 %v186_v0  ;;  %v314_v14 = vld [vmem:[%s634_s1] ss:$0 sm:$0xff]  ;;  %s236_s11 = sshll.u32 %s185_s10, 4  ;;  %s234_s20 = scalar_lea.hbm %s636_s3, %s317_s8  ;;  %s237_s11 = int_to_ptr.vmem [resolvable:$true] %s236_s11 }
  0x36   : > { %v315_v16 = vld [vmem:[%s635_s2] ss:$0 sm:$0xff]  ;;  %s223_s22 = scalar_lea.sflag [#allocation4], %s584_s29  ;;  %s398_s26 = scalar_lea.vmem %s237_s11, 128 }
  0x37   : > { %p399_p11 = scmp.ne.s32.totalorder %s237_s11, %s398_s26  ;;  %p647_p12 = scmp.ne.s32.totalorder %s641_s24, 0 }
  0x38   : > { %s465_s27 = smov [#allocation5]  }
  0x39   : > { %p400_p13 = pnand %p399_p11, %p647_p12  ;;  %s402_s28 = sshll.u32 %s465_s27, 4  ;;  %s403_s28 = int_to_ptr.vmem [resolvable:$false] %s402_s28 }
  0x3a   : > { %s404_s16 = scalar_lea.vmem %s403_s28, 256  ;;  %p405_p3 = scmp.lt.s32.totalorder %s237_s11, %s403_s28 }
  0x3b   : > { %p401_p1 = pneg %p400_p13  ;;  %p406_p5 = scmp.lt.s32.totalorder %s404_s16, %s398_s26 }
  0x3d   : > { %p407_p8 = por %p406_p5, %p405_p3 }
  0x3f   : > { %p408_p10 = pnand %p407_p8, %p401_p1 }
  0xbe   : > { %v188_v1 = vpop.xlane.xlu0 %187 }
  0xbf   : > { %v189_v2 = vmul.f32 0.0078125, %v188_v1 }
  0xc1   : > { %v190_v3 = vsub.f32 %v186_v0, %v189_v2 }
  0xc3   : > { %v191_v4 = vmul.f32 %v190_v3, %v190_v3 }
  0xc5   : > { %192 = vadd.xlane.f32.xlu0 %v191_v4 }
 0x14e   : > { %v193_v5 = vpop.xlane.xlu0 %192 }
 0x14f   : > { %v194_v6 = vmul.f32 0.007874016, %v193_v5 }
 0x151   : > { %366 = vrsqrt.f32 %v194_v6  ;;  %vm197_vm0 = vcmp.eq.f32.partialorder %v194_v6, inf  ;;  %v200_v9 = vand.u32 2147483648, %v194_v6  ;;  %vm199_vm1 = vcmp.eq.f32.partialorder %v194_v6, 0.0 }
 0x15e   : > { %v367_v7 = vpop.eup %366 }
 0x15f   : > { %v196_v8 = vmul.f32 %v367_v7, %v194_v6 }
 0x161   : > { %v198_v10 = vsel %vm197_vm0, %v194_v6, %v196_v8 }
 0x162   : > { %v201_v11 = vsel %vm199_vm1, %v200_v9, %v198_v10 }
 0x163   : > { %v202_v12 = vadd.f32 1e-06, %v201_v11 }
 0x165   : > { %368 = vrcp.f32 %v202_v12 }
 0x172   : > { %v369_v13 = vpop.eup %368 }
 0x173   : > { %v206_v15 = vmul.f32 %v369_v13, %v190_v3 }
 0x175   : > { %v213_v17 = vmul.f32 %v314_v14, %v206_v15 }
 0x177   : > { %v220_v18 = vadd.f32 %v315_v16, %v213_v17 }
 0x179   : > { %221 = vst [vmem:[%s185_s10] sm:$0xff] %v220_v18 }
 0x17a   : > { %411 = shalt.err (!%p408_p10)
}
 0x17b   : > { %s412_s30 = scalar_lea.hbm %s234_s20, 128  ;;  %s416_s9 = scalar_lea.hbm %s636_s3, 256 }
 0x17c   : > { %p413_p2 = scmp.ne.s32.totalorder %s234_s20, %s412_s30  ;;  %p417_p7 = scmp.lt.s32.totalorder %s234_s20, %s636_s3 }
 0x17d   : > { %p418_p0 = scmp.lt.s32.totalorder %s416_s9, %s412_s30 }
 0x17e   : > { %p414_p4 = pnand %p413_p2, %p647_p12 }
 0x17f   : > { %p419_p6 = por %p418_p0, %p417_p7 }
 0x180   : > { %p415_p9 = pneg %p414_p4 }
 0x182   : > { %p420_p11 = pnand %p419_p6, %p415_p9 }
 0x184   : > { %423 = shalt.err (!%p420_p11)
}
 0x185   : > { %322 = dma.vmem_to_hbm [thread:$0]  (%p647_p12), %s237_s11, 128, %s234_s20, %s223_s22  }
 0x186 PF: > { %s248_s6 = sand.u32 1, %s450_s12   ;;  %p648_p13 = scmp.ne.s32.totalorder %s642_s25, 0 }
 0x187   : > { %p649_p1 = scmp.ge.s32.totalorder %s462_s15, 2  ;;  %s249_s7 = scalar_lea.sflag [#allocation4], %s248_s6 }
 0x189   : > { %p329_p3 = pnand %p649_p1, %p648_p13 }
 0x18b   : > { %p330_p5 = pneg %p329_p3 }
 0x18d   : > { %445 = dma.done.wait (%p330_p5), %s249_s7, 128  }
 0x18e   : > { %447 = vsyncadd (%p330_p5), %s249_s7, 4294967168  ;;  %p16_p8 = scmp.ge.s32.totalorder %s511_s18, 4   ;;  %s650_s12 = smov %s454_s13 }
 0x18f   : > { %s651_s13 = smov %s458_s14  ;;  %s652_s14 = smov %s523_s21 }
 0x190   : > { %s653_s15 = smov %s511_s18  ;;  %18 = sbr.rel (!%p16_p8) target bundleno = 5 (0x5), region = 77 }
 0x195   :  { %254 = vsyncpa [#allocation3], 1 }
 0x196   :  { %256 = vsyncpa [#allocation3 + $0x1], 1 }
 0x197   :  { %257 = vsyncpa [#allocation4], 1 }
 0x198   :  { %259 = vsyncpa [#allocation4 + $0x1], 1 }

</bundles_post_ra>
